<compile_context>
chip_gen: v6e
topology: v6e:2x2x1
jax: 0.10.0
libtpu: 0.0.40
codegen_flags: <defaults>
</compile_context>

<pallas_src>
import functools

import numpy as np
import jax
import jax.numpy as jnp
from jax.experimental import pallas as pl
from jax.experimental.pallas import tpu as pltpu

_LANES = 128


def _round_up(x, m):
    return ((x + m - 1) // m) * m


def _ceil_div(a, b):
    return -(-a // b)


# ----------------------------------------------------------------------------
# Pallas kernel: grid = (batch tiles [parallel], L tiles [arbitrary]).
# Causal halos for conv1 (x) and conv2 (h1) live in persistent VMEM scratch
# and are carried across L steps; channels are lane-dense (padded to 128).
# ----------------------------------------------------------------------------
def _temporal_block_kernel(*refs, Lt, pad, pad_al, k, d, has_downsample):
    if has_downsample:
        (x_ref, w1_ref, b1_ref, w2_ref, b2_ref, wd_ref, bd_ref,
         o_ref, xbuf, h1buf) = refs
    else:
        (x_ref, w1_ref, b1_ref, w2_ref, b2_ref,
         o_ref, xbuf, h1buf) = refs

    l = pl.program_id(1)
    bsz, _, cin_p = x_ref.shape          # (B_TILE, Lt, Cin_p) -- static
    cp = o_ref.shape[-1]                 # Cout padded to 128  -- static
    off0 = pad_al - pad                  # first halo row actually read
    m = bsz * Lt                         # matmul M dimension

    # ---- causal halo: zero at the start of each sequence, carry otherwise --
    if pad > 0:
        @pl.when(l == 0)
        def _init_halo():
            xbuf[:, :pad_al, :] = jnp.zeros((bsz, pad_al, cin_p), xbuf.dtype)
            h1buf[:, :pad_al, :] = jnp.zeros((bsz, pad_al, cp), h1buf.dtype)

        @pl.when(l > 0)
        def _carry_halo():
            # aligned pad_al-row window copy: last rows of the previous tile
            # become this tile's left halo (Lt >= pad_al is enforced).
            xbuf[:, :pad_al, :] = xbuf[:, Lt:Lt + pad_al, :]
            h1buf[:, :pad_al, :] = h1buf[:, Lt:Lt + pad_al, :]

    # current x tile into the halo'd buffer (sublane-aligned, lane-dense)
    xbuf[:, pad_al:pad_al + Lt, :] = x_ref[...]

    # ---- conv1: k dilation taps as lane-dense matmuls, f32 accumulation ----
    acc = jnp.broadcast_to(b1_ref[...].astype(jnp.float32), (m, cp))
    for j in range(k):                                 # static unroll over taps
        tap = xbuf[:, off0 + j * d:off0 + j * d + Lt, :].reshape(m, cin_p)
        acc = acc + jnp.dot(tap, w1_ref[j], preferred_element_type=jnp.float32)
    # ReLU (dropout1 = identity); write h1 straight into its halo'd scratch.
    h1buf[:, pad_al:pad_al + Lt, :] = (
        jnp.maximum(acc, 0.0).reshape(bsz, Lt, cp).astype(h1buf.dtype))

    # ---- conv2: same structure on h1 ----------------------------------------
    acc = jnp.broadcast_to(b2_ref[...].astype(jnp.float32), (m, cp))
    for j in range(k):
        tap = h1buf[:, off0 + j * d:off0 + j * d + Lt, :].reshape(m, cp)
        acc = acc + jnp.dot(tap, w2_ref[j], preferred_element_type=jnp.float32)
    h2 = jnp.maximum(acc, 0.0)                         # ReLU (dropout2 = id)

    # ---- residual ------------------------------------------------------------
    if has_downsample:
        res = jnp.dot(x_ref[...].reshape(m, cin_p), wd_ref[...],
                      preferred_element_type=jnp.float32) + bd_ref[...]
    else:
        # n_inputs == n_outputs: residual is the x block itself (exact in f32).
        res = x_ref[...].reshape(m, cp).astype(jnp.float32)

    # ---- final ReLU(out + res) -----------------------------------------------
    o_ref[...] = jnp.maximum(h2 + res, 0.0).reshape(bsz, Lt, cp).astype(
        o_ref.dtype)


# ----------------------------------------------------------------------------
# Wrapper: layout conversion, lane padding, tiling heuristics, pallas_call.
# ----------------------------------------------------------------------------
def temporal_block_forward(x, params, *, kernel_size, dilation, padding,
                           use_bf16=False, x_layout="NCL", out_layout="NCL"):
    """x: (N, Cin, L) if x_layout == 'NCL' (PyTorch) or (N, L, Cin) if 'NLC'."""
    k, d, pad = kernel_size, dilation, padding
    assert pad == d * (k - 1), "TemporalBlock requires padding = dilation*(k-1)"

    w1_t, b1, w2_t, b2, wd_t, bd = (params["w1"], params["b1"], params["w2"],
                                    params["b2"], params["wd"], params["bd"])
    Cout, Cin, _ = w1_t.shape
    has_downsample = wd_t is not None

    x_nlc = jnp.transpose(x, (0, 2, 1)) if x_layout == "NCL" else x
    N, L, _ = x_nlc.shape

    compute_dtype = jnp.bfloat16 if use_bf16 else jnp.float32
    itemsize = 2 if use_bf16 else 4
    sub = 16 if use_bf16 else 8                    # sublane quantum (bf16 packs 16)

    Cin_p = _round_up(Cin, _LANES)                 # lane-dense input channels
    Cp = _round_up(Cout, _LANES)                   # lane-dense output channels
    pad_al = 0 if pad == 0 else _round_up(pad, sub)   # aligned causal halo rows

    # ---- L tiling: keep blocks in the sweet spot, halo carry needs Lt>=pad_al
    max_lt = max(256, pad_al if pad_al else sub)
    grid_l = max(1, _ceil_div(L, max_lt))
    Lt = _round_up(_ceil_div(L, grid_l), sub)
    if pad_al:
        Lt = max(Lt, pad_al)
    grid_l = _ceil_div(L, Lt)
    L_p = Lt * grid_l

    # ---- weights (weight_norm already folded): torch (Cout,Cin,k) -> (k,*,*)
    w1 = jnp.transpose(w1_t, (2, 1, 0))                       # (k, Cin, Cout)
    w1 = jnp.pad(w1, ((0, 0), (0, Cin_p - Cin), (0, Cp - Cout))).astype(
        compute_dtype)                                        # (k, Cin_p, Cp)
    w2 = jnp.transpose(w2_t, (2, 1, 0))                       # (k, Cout, Cout)
    w2 = jnp.pad(w2, ((0, 0), (0, Cp - Cout), (0, Cp - Cout))).astype(
        compute_dtype)                                        # (k, Cp, Cp)
    b1p = jnp.pad(b1.reshape(1, Cout), ((0, 0), (0, Cp - Cout))).astype(
        jnp.float32)
    b2p = jnp.pad(b2.reshape(1, Cout), ((0, 0), (0, Cp - Cout))).astype(
        jnp.float32)
    if has_downsample:
        wd = jnp.transpose(wd_t[:, :, 0], (1, 0))             # (Cin, Cout)
        wd = jnp.pad(wd, ((0, Cin_p - Cin), (0, Cp - Cout))).astype(
            compute_dtype)                                    # (Cin_p, Cp)
        bdp = jnp.pad(bd.reshape(1, Cout), ((0, 0), (0, Cp - Cout))).astype(
            jnp.float32)

    # ---- batch tiling from an explicit VMEM budget + pipelining target ------
    weights_bytes = (k * Cin_p * Cp + k * Cp * Cp
                     + (Cin_p * Cp if has_downsample else 0)) * itemsize * 2
    weights_bytes += 4 * Cp * 4 * 2                            # biases
    per_b = ((Lt * Cin_p * itemsize + Lt * Cp * 4) * 2         # x/out blocks, 2-buf
             + (pad_al + Lt) * (Cin_p + Cp) * itemsize         # halo scratches
             + 3 * Lt * Cp * 4)                                # live f32 temporaries
    budget = 40 * 1024 * 1024                                  # fits v7x 64 MiB
    bt_budget = max(1, (budget - weights_bytes) // per_b)
    target_steps = 8                                           # >=4 per megacore
    gn_min = max(1, _ceil_div(target_steps, grid_l))
    bt_steps = max(1, N // gn_min)
    b_tile = int(max(1, min(bt_budget, bt_steps, N, 8)))
    n_pad = _round_up(N, b_tile)
    grid_n = n_pad // b_tile

    # ---- activations: single pad to lane/tile-dense NLC operand -------------
    xop = jnp.pad(x_nlc, ((0, n_pad - N), (0, L_p - L),
                          (0, Cin_p - Cin))).astype(compute_dtype)

    in_specs = [
        pl.BlockSpec((b_tile, Lt, Cin_p), lambda n, l: (n, l, 0)),
        pl.BlockSpec((k, Cin_p, Cp), lambda n, l: (0, 0, 0)),
        pl.BlockSpec((1, Cp), lambda n, l: (0, 0)),
        pl.BlockSpec((k, Cp, Cp), lambda n, l: (0, 0, 0)),
        pl.BlockSpec((1, Cp), lambda n, l: (0, 0)),
    ]
    operands = [xop, w1, b1p, w2, b2p]
    if has_downsample:
        in_specs += [pl.BlockSpec((Cin_p, Cp), lambda n, l: (0, 0)),
                     pl.BlockSpec((1, Cp), lambda n, l: (0, 0))]
        operands += [wd, bdp]

    flops = 2 * n_pad * L_p * Cp * (k * Cin_p + k * Cp
                                    + (Cin_p if has_downsample else 0))
    bytes_accessed = (n_pad * L_p * Cin_p * itemsize
                      + (k * Cin_p * Cp + k * Cp * Cp
                         + (Cin_p * Cp if has_downsample else 0)) * itemsize
                      + n_pad * L_p * Cp * 4)
    est_vmem = weights_bytes + per_b * b_tile
    vmem_limit = int(min(max(est_vmem * 3 // 2, 32 * 1024 * 1024),
                         56 * 1024 * 1024))

    out_nlc = pl.pallas_call(
        functools.partial(_temporal_block_kernel, Lt=Lt, pad=pad,
                          pad_al=pad_al, k=k, d=d,
                          has_downsample=has_downsample),
        out_shape=jax.ShapeDtypeStruct((n_pad, L_p, Cp), jnp.float32),
        grid_spec=pltpu.PrefetchScalarGridSpec(
            num_scalar_prefetch=0,
            grid=(grid_n, grid_l),
            in_specs=in_specs,
            out_specs=pl.BlockSpec((b_tile, Lt, Cp), lambda n, l: (n, l, 0)),
            scratch_shapes=[
                pltpu.VMEM((b_tile, pad_al + Lt, Cin_p), compute_dtype),
                pltpu.VMEM((b_tile, pad_al + Lt, Cp), compute_dtype),
            ],
        ),
        compiler_params=pltpu.CompilerParams(
            dimension_semantics=("parallel", "arbitrary"),
            vmem_limit_bytes=vmem_limit),
        cost_estimate=pl.CostEstimate(flops=int(flops), transcendentals=0,
                                      bytes_accessed=int(bytes_accessed)),
    )(*operands)

    out = out_nlc[:N, :L, :Cout]                  # drop batch/L/channel padding
    if out_layout == "NCL":
        out = jnp.transpose(out, (0, 2, 1))       # back to PyTorch layout
    return out.astype(x.dtype)


# ----------------------------------------------------------------------------
# Deterministic parameter init (weight_norm semantics: w = g * v / ||v||).
# ----------------------------------------------------------------------------
def init_params(key, n_inputs, n_outputs, kernel_size):
    ks = jax.random.split(key, 8)

    def wn_weight(kv, kg, shape):
        v = 0.01 * jax.random.normal(kv, shape, jnp.float32)
        norm = jnp.sqrt(jnp.sum(v * v, axis=(1, 2), keepdims=True))
        g = jax.random.uniform(kg, (shape[0], 1, 1), jnp.float32, 0.5, 1.5)
        return g * v / norm

    w1 = wn_weight(ks[0], ks[1], (n_outputs, n_inputs, kernel_size))
    w2 = wn_weight(ks[2], ks[3], (n_outputs, n_outputs, kernel_size))
    bnd1 = 1.0 / np.sqrt(n_inputs * kernel_size)
    bnd2 = 1.0 / np.sqrt(n_outputs * kernel_size)
    b1 = jax.random.uniform(ks[4], (n_outputs,), jnp.float32, -bnd1, bnd1)
    b2 = jax.random.uniform(ks[5], (n_outputs,), jnp.float32, -bnd2, bnd2)
    if n_inputs != n_outputs:
        wd = 0.01 * jax.random.normal(ks[6], (n_outputs, n_inputs, 1),
                                      jnp.float32)
        bd = jax.random.uniform(ks[7], (n_outputs,), jnp.float32,
                                -1.0 / np.sqrt(n_inputs),
                                1.0 / np.sqrt(n_inputs))
    else:
        wd, bd = None, None
    return {"w1": w1, "b1": b1, "w2": w2, "b2": b2, "wd": wd, "bd": bd}


# ----------------------------------------------------------------------------
# Pure-JAX reference (mirrors the PyTorch forward exactly) for verification.
# ----------------------------------------------------------------------------
def reference_forward(x_ncl, params, *, kernel_size, dilation, padding):
    def conv1d(x, w, b, pad, dil):
        y = jax.lax.conv_general_dilated(
            x, w, window_strides=(1,), padding=[(pad, pad)],
            rhs_dilation=(dil,), dimension_numbers=("NCH", "OIH", "NCH"))
        return y + b[None, :, None]

    # NOTE: like the PyTorch module, this assumes padding > 0 (chomp slices).
    out = conv1d(x_ncl, params["w1"], params["b1"], padding, dilation)
    out = jnp.maximum(out[:, :, :-padding], 0.0)          # chomp1 + relu1
    out = conv1d(out, params["w2"], params["b2"], padding, dilation)
    out = jnp.maximum(out[:, :, :-padding], 0.0)          # chomp2 + relu2
    if params["wd"] is None:
        res = x_ncl
    else:
        res = conv1d(x_ncl, params["wd"], params["bd"], 0, 1)
    return jnp.maximum(out + res, 0.0)


if __name__ == "__main__":
    KERNEL_SIZE, STRIDE, DILATION = 3, 1, 2
    PADDING = (KERNEL_SIZE - 1) * DILATION          # 4 (standard TCN padding)
    key = jax.random.PRNGKey(0)

    # Case 1: n_inputs != n_outputs (downsample 1x1 conv on the residual), f32.
    N, C_IN, C_OUT, L = 2, 4, 8, 16
    k_x, k_p, key = jax.random.split(key, 3)
    x = jax.random.normal(k_x, (N, C_IN, L), jnp.float32)
    params = init_params(k_p, C_IN, C_OUT, KERNEL_SIZE)
    out = temporal_block_forward(x, params, kernel_size=KERNEL_SIZE,
                                 dilation=DILATION, padding=PADDING)
    out = jax.block_until_ready(out)
    ref = reference_forward(x, params, kernel_size=KERNEL_SIZE,
                            dilation=DILATION, padding=PADDING)
    np.testing.assert_allclose(np.asarray(out), np.asarray(ref),
                               rtol=1e-5, atol=1e-5)

    # Case 2: n_inputs == n_outputs (identity residual, exact add), f32.
    N2, C2, L2 = 2, 8, 16
    k_x2, k_p2 = jax.random.split(key)
    x2 = jax.random.normal(k_x2, (N2, C2, L2), jnp.float32)
    params2 = init_params(k_p2, C2, C2, KERNEL_SIZE)
    out2 = temporal_block_forward(x2, params2, kernel_size=KERNEL_SIZE,
                                  dilation=DILATION, padding=PADDING)
    out2 = jax.block_until_ready(out2)
    ref2 = reference_forward(x2, params2, kernel_size=KERNEL_SIZE,
                             dilation=DILATION, padding=PADDING)
    np.testing.assert_allclose(np.asarray(out2), np.asarray(ref2),
                               rtol=1e-5, atol=1e-5)

    # Case 3: bf16 MXU path (v6e/v7x-friendly), loose tolerance vs f32 ref.
    out3 = temporal_block_forward(x, params, kernel_size=KERNEL_SIZE,
                                  dilation=DILATION, padding=PADDING,
                                  use_bf16=True)
    out3 = jax.block_until_ready(out3)
    np.testing.assert_allclose(np.asarray(out3), np.asarray(ref),
                               rtol=5e-2, atol=5e-2)

    print("KERNEL_OK")
</pallas_src>

<mosaic_0001>
module attributes {stable_mosaic.version = 11 : i64} {
  func.func @_temporal_block_kernel(%arg0: i32, %arg1: i32, %arg2: memref<1x16x128xf32, #tpu.memory_space<vmem>>, %arg3: memref<3x128x128xf32, #tpu.memory_space<vmem>>, %arg4: memref<1x128xf32, #tpu.memory_space<vmem>>, %arg5: memref<3x128x128xf32, #tpu.memory_space<vmem>>, %arg6: memref<1x128xf32, #tpu.memory_space<vmem>>, %arg7: memref<128x128xf32, #tpu.memory_space<vmem>>, %arg8: memref<1x128xf32, #tpu.memory_space<vmem>>, %arg9: memref<1x16x128xf32, #tpu.memory_space<vmem>>, %arg10: memref<1x24x128xf32, #tpu.memory_space<vmem>>, %arg11: memref<1x24x128xf32, #tpu.memory_space<vmem>>) attributes {dimension_semantics = [#tpu.dimension_semantics<parallel>, #tpu.dimension_semantics<arbitrary>], iteration_bounds = array<i64: 2, 1>, scalar_prefetch = 0 : i64, scratch_operands = 2 : i64, tpu.core_type = #tpu.core_type<tc>, window_params = [{transform_indices = @transform_0, window_bounds = array<i64: 1, 16, 128>}, {pipeline_mode = #tpu.pipeline_mode<synchronous>, transform_indices = @transform_1, window_bounds = array<i64: 3, 128, 128>}, {pipeline_mode = #tpu.pipeline_mode<synchronous>, transform_indices = @transform_2, window_bounds = array<i64: 1, 128>}, {pipeline_mode = #tpu.pipeline_mode<synchronous>, transform_indices = @transform_3, window_bounds = array<i64: 3, 128, 128>}, {pipeline_mode = #tpu.pipeline_mode<synchronous>, transform_indices = @transform_4, window_bounds = array<i64: 1, 128>}, {pipeline_mode = #tpu.pipeline_mode<synchronous>, transform_indices = @transform_5, window_bounds = array<i64: 128, 128>}, {pipeline_mode = #tpu.pipeline_mode<synchronous>, transform_indices = @transform_6, window_bounds = array<i64: 1, 128>}, {transform_indices = @transform_7, window_bounds = array<i64: 1, 16, 128>}]} {
    %c0_i32 = arith.constant 0 : i32
    %0 = arith.cmpi eq, %arg1, %c0_i32 : i32
    %1 = arith.extui %0 : i1 to i32
    %c0_i32_0 = arith.constant 0 : i32
    %2 = arith.cmpi ne, %1, %c0_i32_0 : i32
    scf.if %2 {
      %cst_65 = arith.constant 0.000000e+00 : f32
      %68 = vector.broadcast %cst_65 : f32 to vector<1x8x128xf32>
      %c0_66 = arith.constant 0 : index
      %c0_67 = arith.constant 0 : index
      %c0_68 = arith.constant 0 : index
      %69 = vector.load %arg10[%c0_66, %c0_67, %c0_68] : memref<1x24x128xf32, #tpu.memory_space<vmem>>, vector<1x8x128xf32>
      tpu.vector_store %arg10[%c0_66, %c0_67, %c0_68], %68 {strides = array<i32>} : memref<1x24x128xf32, #tpu.memory_space<vmem>>, vector<1x8x128xf32>,
      %cst_69 = arith.constant 0.000000e+00 : f32
      %70 = vector.broadcast %cst_69 : f32 to vector<1x8x128xf32>
      %c0_70 = arith.constant 0 : index
      %c0_71 = arith.constant 0 : index
      %c0_72 = arith.constant 0 : index
      %71 = vector.load %arg11[%c0_70, %c0_71, %c0_72] : memref<1x24x128xf32, #tpu.memory_space<vmem>>, vector<1x8x128xf32>
      tpu.vector_store %arg11[%c0_70, %c0_71, %c0_72], %70 {strides = array<i32>} : memref<1x24x128xf32, #tpu.memory_space<vmem>>, vector<1x8x128xf32>,
    } else {
    }
    %c0_i32_1 = arith.constant 0 : i32
    %3 = arith.cmpi sgt, %arg1, %c0_i32_1 : i32
    %4 = arith.extui %3 : i1 to i32
    %c0_i32_2 = arith.constant 0 : i32
    %5 = arith.cmpi ne, %4, %c0_i32_2 : i32
    scf.if %5 {
      %c0_65 = arith.constant 0 : index
      %c16 = arith.constant 16 : index
      %c0_66 = arith.constant 0 : index
      %68 = vector.load %arg10[%c0_65, %c16, %c0_66] : memref<1x24x128xf32, #tpu.memory_space<vmem>>, vector<1x8x128xf32>
      %c0_67 = arith.constant 0 : index
      %c0_68 = arith.constant 0 : index
      %c0_69 = arith.constant 0 : index
      %69 = vector.load %arg10[%c0_67, %c0_68, %c0_69] : memref<1x24x128xf32, #tpu.memory_space<vmem>>, vector<1x8x128xf32>
      tpu.vector_store %arg10[%c0_67, %c0_68, %c0_69], %68 {strides = array<i32>} : memref<1x24x128xf32, #tpu.memory_space<vmem>>, vector<1x8x128xf32>,
      %c0_70 = arith.constant 0 : index
      %c16_71 = arith.constant 16 : index
      %c0_72 = arith.constant 0 : index
      %70 = vector.load %arg11[%c0_70, %c16_71, %c0_72] : memref<1x24x128xf32, #tpu.memory_space<vmem>>, vector<1x8x128xf32>
      %c0_73 = arith.constant 0 : index
      %c0_74 = arith.constant 0 : index
      %c0_75 = arith.constant 0 : index
      %71 = vector.load %arg11[%c0_73, %c0_74, %c0_75] : memref<1x24x128xf32, #tpu.memory_space<vmem>>, vector<1x8x128xf32>
      tpu.vector_store %arg11[%c0_73, %c0_74, %c0_75], %70 {strides = array<i32>} : memref<1x24x128xf32, #tpu.memory_space<vmem>>, vector<1x8x128xf32>,
    } else {
    }
    %c0 = arith.constant 0 : index
    %c0_3 = arith.constant 0 : index
    %c0_4 = arith.constant 0 : index
    %6 = vector.load %arg2[%c0, %c0_3, %c0_4] : memref<1x16x128xf32, #tpu.memory_space<vmem>>, vector<1x16x128xf32>
    %c0_5 = arith.constant 0 : index
    %c8 = arith.constant 8 : index
    %c0_6 = arith.constant 0 : index
    %7 = vector.load %arg10[%c0_5, %c8, %c0_6] : memref<1x24x128xf32, #tpu.memory_space<vmem>>, vector<1x16x128xf32>
    tpu.vector_store %arg10[%c0_5, %c8, %c0_6], %6 {strides = array<i32>} : memref<1x24x128xf32, #tpu.memory_space<vmem>>, vector<1x16x128xf32>,
    %c0_7 = arith.constant 0 : index
    %c0_8 = arith.constant 0 : index
    %8 = vector.load %arg4[%c0_7, %c0_8] : memref<1x128xf32, #tpu.memory_space<vmem>>, vector<1x128xf32>
    %9 = vector.shape_cast %8 : vector<1x128xf32> to vector<1x128xf32>
    %10 = vector.broadcast %9 : vector<1x128xf32> to vector<16x128xf32>
    %c0_9 = arith.constant 0 : index
    %c4 = arith.constant 4 : index
    %c0_10 = arith.constant 0 : index
    %11 = vector.load %arg10[%c0_9, %c4, %c0_10] : memref<1x24x128xf32, #tpu.memory_space<vmem>>, vector<1x16x128xf32>
    %12 = vector.shape_cast %11 : vector<1x16x128xf32> to vector<16x128xf32>
    %c0_11 = arith.constant 0 : index
    %c0_12 = arith.constant 0 : index
    %c0_13 = arith.constant 0 : index
    %13 = vector.load %arg3[%c0_11, %c0_12, %c0_13] : memref<3x128x128xf32, #tpu.memory_space<vmem>>, vector<1x128x128xf32>
    %14 = vector.shape_cast %13 : vector<1x128x128xf32> to vector<128x128xf32>
    %cst = arith.constant dense<0.000000e+00> : vector<16x128xf32>
    %15 = tpu.matmul %12, %14, %cst {dimension_numbers = #tpu.dot_dimension_numbers<[1], [0], [0], [1], [0, 0, 1, 1], [], []>} : vector<16x128xf32>, vector<128x128xf32>, vector<16x128xf32> -> vector<16x128xf32>
    %16 = arith.addf %10, %15 : vector<16x128xf32>
    %c0_14 = arith.constant 0 : index
    %c6 = arith.constant 6 : index
    %c0_15 = arith.constant 0 : index
    %17 = vector.load %arg10[%c0_14, %c6, %c0_15] : memref<1x24x128xf32, #tpu.memory_space<vmem>>, vector<1x16x128xf32>
    %18 = vector.shape_cast %17 : vector<1x16x128xf32> to vector<16x128xf32>
    %c1 = arith.constant 1 : index
    %c0_16 = arith.constant 0 : index
    %c0_17 = arith.constant 0 : index
    %19 = vector.load %arg3[%c1, %c0_16, %c0_17] : memref<3x128x128xf32, #tpu.memory_space<vmem>>, vector<1x128x128xf32>
    %20 = vector.shape_cast %19 : vector<1x128x128xf32> to vector<128x128xf32>
    %cst_18 = arith.constant dense<0.000000e+00> : vector<16x128xf32>
    %21 = tpu.matmul %18, %20, %cst_18 {dimension_numbers = #tpu.dot_dimension_numbers<[1], [0], [0], [1], [0, 0, 1, 1], [], []>} : vector<16x128xf32>, vector<128x128xf32>, vector<16x128xf32> -> vector<16x128xf32>
    %22 = arith.addf %16, %21 : vector<16x128xf32>
    %c0_19 = arith.constant 0 : index
    %c8_20 = arith.constant 8 : index
    %c0_21 = arith.constant 0 : index
    %23 = vector.load %arg10[%c0_19, %c8_20, %c0_21] : memref<1x24x128xf32, #tpu.memory_space<vmem>>, vector<1x16x128xf32>
    %24 = vector.shape_cast %23 : vector<1x16x128xf32> to vector<16x128xf32>
    %c2 = arith.constant 2 : index
    %c0_22 = arith.constant 0 : index
    %c0_23 = arith.constant 0 : index
    %25 = vector.load %arg3[%c2, %c0_22, %c0_23] : memref<3x128x128xf32, #tpu.memory_space<vmem>>, vector<1x128x128xf32>
    %26 = vector.shape_cast %25 : vector<1x128x128xf32> to vector<128x128xf32>
    %cst_24 = arith.constant dense<0.000000e+00> : vector<16x128xf32>
    %27 = tpu.matmul %24, %26, %cst_24 {dimension_numbers = #tpu.dot_dimension_numbers<[1], [0], [0], [1], [0, 0, 1, 1], [], []>} : vector<16x128xf32>, vector<128x128xf32>, vector<16x128xf32> -> vector<16x128xf32>
    %28 = arith.addf %22, %27 : vector<16x128xf32>
    %cst_25 = arith.constant 0.000000e+00 : f32
    %29 = vector.broadcast %cst_25 : f32 to vector<16x128xf32>
    %30 = arith.maximumf %28, %29 : vector<16x128xf32>
    %31 = vector.shape_cast %30 : vector<16x128xf32> to vector<1x16x128xf32>
    %c0_26 = arith.constant 0 : index
    %c8_27 = arith.constant 8 : index
    %c0_28 = arith.constant 0 : index
    %32 = vector.load %arg11[%c0_26, %c8_27, %c0_28] : memref<1x24x128xf32, #tpu.memory_space<vmem>>, vector<1x16x128xf32>
    tpu.vector_store %arg11[%c0_26, %c8_27, %c0_28], %31 {strides = array<i32>} : memref<1x24x128xf32, #tpu.memory_space<vmem>>, vector<1x16x128xf32>,
    %c0_29 = arith.constant 0 : index
    %c0_30 = arith.constant 0 : index
    %33 = vector.load %arg6[%c0_29, %c0_30] : memref<1x128xf32, #tpu.memory_space<vmem>>, vector<1x128xf32>
    %34 = vector.shape_cast %33 : vector<1x128xf32> to vector<1x128xf32>
    %35 = vector.broadcast %34 : vector<1x128xf32> to vector<16x128xf32>
    %c0_31 = arith.constant 0 : index
    %c4_32 = arith.constant 4 : index
    %c0_33 = arith.constant 0 : index
    %36 = vector.load %arg11[%c0_31, %c4_32, %c0_33] : memref<1x24x128xf32, #tpu.memory_space<vmem>>, vector<1x16x128xf32>
    %37 = vector.shape_cast %36 : vector<1x16x128xf32> to vector<16x128xf32>
    %c0_34 = arith.constant 0 : index
    %c0_35 = arith.constant 0 : index
    %c0_36 = arith.constant 0 : index
    %38 = vector.load %arg5[%c0_34, %c0_35, %c0_36] : memref<3x128x128xf32, #tpu.memory_space<vmem>>, vector<1x128x128xf32>
    %39 = vector.shape_cast %38 : vector<1x128x128xf32> to vector<128x128xf32>
    %cst_37 = arith.constant dense<0.000000e+00> : vector<16x128xf32>
    %40 = tpu.matmul %37, %39, %cst_37 {dimension_numbers = #tpu.dot_dimension_numbers<[1], [0], [0], [1], [0, 0, 1, 1], [], []>} : vector<16x128xf32>, vector<128x128xf32>, vector<16x128xf32> -> vector<16x128xf32>
    %41 = arith.addf %35, %40 : vector<16x128xf32>
    %c0_38 = arith.constant 0 : index
    %c6_39 = arith.constant 6 : index
    %c0_40 = arith.constant 0 : index
    %42 = vector.load %arg11[%c0_38, %c6_39, %c0_40] : memref<1x24x128xf32, #tpu.memory_space<vmem>>, vector<1x16x128xf32>
    %43 = vector.shape_cast %42 : vector<1x16x128xf32> to vector<16x128xf32>
    %c1_41 = arith.constant 1 : index
    %c0_42 = arith.constant 0 : index
    %c0_43 = arith.constant 0 : index
    %44 = vector.load %arg5[%c1_41, %c0_42, %c0_43] : memref<3x128x128xf32, #tpu.memory_space<vmem>>, vector<1x128x128xf32>
    %45 = vector.shape_cast %44 : vector<1x128x128xf32> to vector<128x128xf32>
    %cst_44 = arith.constant dense<0.000000e+00> : vector<16x128xf32>
    %46 = tpu.matmul %43, %45, %cst_44 {dimension_numbers = #tpu.dot_dimension_numbers<[1], [0], [0], [1], [0, 0, 1, 1], [], []>} : vector<16x128xf32>, vector<128x128xf32>, vector<16x128xf32> -> vector<16x128xf32>
    %47 = arith.addf %41, %46 : vector<16x128xf32>
    %c0_45 = arith.constant 0 : index
    %c8_46 = arith.constant 8 : index
    %c0_47 = arith.constant 0 : index
    %48 = vector.load %arg11[%c0_45, %c8_46, %c0_47] : memref<1x24x128xf32, #tpu.memory_space<vmem>>, vector<1x16x128xf32>
    %49 = vector.shape_cast %48 : vector<1x16x128xf32> to vector<16x128xf32>
    %c2_48 = arith.constant 2 : index
    %c0_49 = arith.constant 0 : index
    %c0_50 = arith.constant 0 : index
    %50 = vector.load %arg5[%c2_48, %c0_49, %c0_50] : memref<3x128x128xf32, #tpu.memory_space<vmem>>, vector<1x128x128xf32>
    %51 = vector.shape_cast %50 : vector<1x128x128xf32> to vector<128x128xf32>
    %cst_51 = arith.constant dense<0.000000e+00> : vector<16x128xf32>
    %52 = tpu.matmul %49, %51, %cst_51 {dimension_numbers = #tpu.dot_dimension_numbers<[1], [0], [0], [1], [0, 0, 1, 1], [], []>} : vector<16x128xf32>, vector<128x128xf32>, vector<16x128xf32> -> vector<16x128xf32>
    %53 = arith.addf %47, %52 : vector<16x128xf32>
    %cst_52 = arith.constant 0.000000e+00 : f32
    %54 = vector.broadcast %cst_52 : f32 to vector<16x128xf32>
    %55 = arith.maximumf %53, %54 : vector<16x128xf32>
    %c0_53 = arith.constant 0 : index
    %c0_54 = arith.constant 0 : index
    %c0_55 = arith.constant 0 : index
    %56 = vector.load %arg2[%c0_53, %c0_54, %c0_55] : memref<1x16x128xf32, #tpu.memory_space<vmem>>, vector<1x16x128xf32>
    %57 = vector.shape_cast %56 : vector<1x16x128xf32> to vector<16x128xf32>
    %c0_56 = arith.constant 0 : index
    %c0_57 = arith.constant 0 : index
    %58 = vector.load %arg7[%c0_56, %c0_57] : memref<128x128xf32, #tpu.memory_space<vmem>>, vector<128x128xf32>
    %cst_58 = arith.constant dense<0.000000e+00> : vector<16x128xf32>
    %59 = tpu.matmul %57, %58, %cst_58 {dimension_numbers = #tpu.dot_dimension_numbers<[1], [0], [0], [1], [0, 0, 1, 1], [], []>} : vector<16x128xf32>, vector<128x128xf32>, vector<16x128xf32> -> vector<16x128xf32>
    %c0_59 = arith.constant 0 : index
    %c0_60 = arith.constant 0 : index
    %60 = vector.load %arg8[%c0_59, %c0_60] : memref<1x128xf32, #tpu.memory_space<vmem>>, vector<1x128xf32>
    %61 = vector.broadcast %60 : vector<1x128xf32> to vector<16x128xf32>
    %62 = arith.addf %59, %61 : vector<16x128xf32>
    %63 = arith.addf %55, %62 : vector<16x128xf32>
    %cst_61 = arith.constant 0.000000e+00 : f32
    %64 = vector.broadcast %cst_61 : f32 to vector<16x128xf32>
    %65 = arith.maximumf %63, %64 : vector<16x128xf32>
    %66 = vector.shape_cast %65 : vector<16x128xf32> to vector<1x16x128xf32>
    %c0_62 = arith.constant 0 : index
    %c0_63 = arith.constant 0 : index
    %c0_64 = arith.constant 0 : index
    %67 = vector.load %arg9[%c0_62, %c0_63, %c0_64] : memref<1x16x128xf32, #tpu.memory_space<vmem>>, vector<1x16x128xf32>
    tpu.vector_store %arg9[%c0_62, %c0_63, %c0_64], %66 {strides = array<i32>} : memref<1x16x128xf32, #tpu.memory_space<vmem>>, vector<1x16x128xf32>,
    return
  }
  func.func @transform_0(%arg0: i32, %arg1: i32) -> (i32, i32, i32) {
    %c0_i32 = arith.constant 0 : i32
    %c0_i32_0 = arith.constant 0 : i32
    return %arg0, %arg1, %c0_i32 : i32, i32, i32
  }
  func.func @transform_1(%arg0: i32, %arg1: i32) -> (i32, i32, i32) {
    %c0_i32 = arith.constant 0 : i32
    %c0_i32_0 = arith.constant 0 : i32
    %c0_i32_1 = arith.constant 0 : i32
    %c0_i32_2 = arith.constant 0 : i32
    return %c0_i32, %c0_i32_0, %c0_i32_1 : i32, i32, i32
  }
  func.func @transform_2(%arg0: i32, %arg1: i32) -> (i32, i32) {
    %c0_i32 = arith.constant 0 : i32
    %c0_i32_0 = arith.constant 0 : i32
    %c0_i32_1 = arith.constant 0 : i32
    return %c0_i32, %c0_i32_0 : i32, i32
  }
  func.func @transform_3(%arg0: i32, %arg1: i32) -> (i32, i32, i32) {
    %c0_i32 = arith.constant 0 : i32
    %c0_i32_0 = arith.constant 0 : i32
    %c0_i32_1 = arith.constant 0 : i32
    %c0_i32_2 = arith.constant 0 : i32
    return %c0_i32, %c0_i32_0, %c0_i32_1 : i32, i32, i32
  }
  func.func @transform_4(%arg0: i32, %arg1: i32) -> (i32, i32) {
    %c0_i32 = arith.constant 0 : i32
    %c0_i32_0 = arith.constant 0 : i32
    %c0_i32_1 = arith.constant 0 : i32
    return %c0_i32, %c0_i32_0 : i32, i32
  }
  func.func @transform_5(%arg0: i32, %arg1: i32) -> (i32, i32) {
    %c0_i32 = arith.constant 0 : i32
    %c0_i32_0 = arith.constant 0 : i32
    %c0_i32_1 = arith.constant 0 : i32
    return %c0_i32, %c0_i32_0 : i32, i32
  }
  func.func @transform_6(%arg0: i32, %arg1: i32) -> (i32, i32) {
    %c0_i32 = arith.constant 0 : i32
    %c0_i32_0 = arith.constant 0 : i32
    %c0_i32_1 = arith.constant 0 : i32
    return %c0_i32, %c0_i32_0 : i32, i32
  }
  func.func @transform_7(%arg0: i32, %arg1: i32) -> (i32, i32, i32) {
    %c0_i32 = arith.constant 0 : i32
    %c0_i32_0 = arith.constant 0 : i32
    return %arg0, %arg1, %c0_i32 : i32, i32, i32
  }
}

</mosaic_0001>

<bundles_post_ra>
// kernel: tpu_custom_call.1
= control target key start
LH: loop header
LB: loop body
LE: loop exit
PB: predicated region body
PF: predicated region fallthrough
CT: control target
= control target key end

     0   :  { %s2198_s0 = inlined_call_operand.hbm [shape: f32[2,16,128], index: 0, kind: input, shape index: {}]   ;;  %s2199_s1 = inlined_call_operand.hbm [shape: f32[3,128,128], index: 1, kind: input, shape index: {}]   ;;  %s2200_s2 = inlined_call_operand.vmem [shape: f32[1,128], index: 2, kind: input, shape index: {}]   ;;  %s2201_s3 = inlined_call_operand.hbm [shape: f32[3,128,128], index: 3, kind: input, shape index: {}]   ;;  %s2202_s4 = inlined_call_operand.vmem [shape: f32[1,128], index: 4, kind: input, shape index: {}]   ;;  %s2203_s5 = inlined_call_operand.hbm [shape: f32[128,128], index: 5, kind: input, shape index: {}]   ;;  %s2204_s6 = inlined_call_operand.vmem [shape: f32[1,128], index: 6, kind: input, shape index: {}]   ;;  %s2205_s7 = inlined_call_operand.hbm [shape: f32[2,16,128], index: 7, kind: output, shape index: {}]  }
   0x1   :  { %2209 = sst [smem:[#allocation17_spill]] %s2199_s1 }
   0x2   :  { %2210 = sst [smem:[#allocation18_spill]] %s2201_s3 }
   0x3   :  { %2211 = sst [smem:[#allocation19_spill]] %s2203_s5 }
   0x4   :  { %12 = vsyncpa [#allocation5], 0 }
   0x5   :  { %14 = vsyncpa [#allocation5 + $0x1], 0 }
   0x6   :  { %15 = vsyncpa [#allocation8], 0 }
   0x7   :  { %16 = vsyncpa [#allocation11], 0 }
   0x8   :  { %17 = vsyncpa [#allocation6], 0 }
   0x9   :  { %19 = vsyncpa [#allocation6 + $0x1], 0  ;;  %s1952_s24 = smov 0   ;;  %s1954_s25 = smov 0  }
   0xa   :  { %s1956_s26 = smov 0   ;;  %s1958_s27 = smov 0  }
   0xb   :  { %s1960_s28 = smov 0   ;;  %s1962_s29 = smov 0  }
   0xc LB: > { %s1211_s30 = sadd.s32 4294967295, %s1900_s29   ;;  %s1212_s8 = sadd.s32 4294967294, %s1900_s29   ;;  %s1900_s29 = sphi %s1962_s29, %s25_s29   ;;  %s1896_s28 = sphi %s1960_s28, %s2232_s28   ;;  %s1892_s27 = sphi %s1958_s27, %s2231_s27   ;;  %s1888_s26 = sphi %s1956_s26, %s2230_s26   ;;  %s1884_s25 = sphi %s1954_s25, %s2229_s25   ;;  %s1880_s24 = sphi %s1952_s24, %s2228_s24  }
   0xd   : > { %p59_p0 = scmp.ne.s32.totalorder %s1884_s25, %s1880_s24  ;;  %p1986_p1 = scmp.eq.s32.totalorder %s1211_s30, 0 }
   0xe   : > { %p1990_p2 = scmp.eq.s32.totalorder %s1211_s30, 1  ;;  %p217_p3 = scmp.eq.s32.totalorder %s1212_s8, 1 }
   0xf   : > { %p1996_p4 = por %p1986_p1, %p59_p0  ;;  %p1213_p5 = scmp.ge.s32.totalorder %s1900_s29, 1 }
  0x10   : > { %p2001_p6 = por %p217_p3, %p59_p0  ;;  %p224_p7 = scmp.lt.s32.totalorder %s1900_s29, 3 }
  0x11   : > { %s1902_s14 = smov [#allocation7]   ;;  %s1903_s17 = smov [#allocation9]  }
  0x12   : > { %s2215_s12 = scalar_select %p2001_p6, 1, 0 }
  0x13   : > { %p2006_p8 = pnand %p1213_p5, %p224_p7  ;;  %s236_s15 = sshll.u32 %s1902_s14, 4  ;;  %s237_s15 = int_to_ptr.vmem [resolvable:$true] %s236_s15 }
  0x14   : > { %s252_s18 = sshll.u32 %s1903_s17, 4  ;;  %s1904_s19 = smov [#allocation10]   ;;  %s253_s18 = int_to_ptr.vmem [resolvable:$true] %s252_s18 }
  0x15   : > { %p1624_p9 = pneg %p2006_p8  ;;  %s268_s20 = sshll.u32 %s1904_s19, 4  ;;  %s269_s20 = int_to_ptr.vmem [resolvable:$true] %s268_s20 }
  0x16   : > { %s1717_s21 = scalar_lea.vmem %s237_s15, 6144  ;;  %p1725_p5 = scmp.lt.s32.totalorder %s237_s15, %s237_s15 }
  0x17   : > { %p2015_p11 = pnand %p1624_p9, %p1986_p1  ;;  %p1718_p13 = scmp.ne.s32.totalorder %s237_s15, %s1717_s21 }
  0x18   : > { %p1726_p7 = scmp.lt.s32.totalorder %s1717_s21, %s1717_s21 }
  0x19   : > { %p1708_p12 = pneg %p2015_p11 }
  0x1a   : > { %p1727_p9 = por %p1726_p7, %p1725_p5 }
  0x1b   : > { %p1720_p0 = pnand %p1718_p13, %p1708_p12 }
  0x1d   : > { %p1721_p3 = pneg %p1720_p0 }
  0x1f   : > { %p1728_p10 = pnand %p1727_p9, %p1721_p3 }
  0x21   : > { %1731 = shalt.err (!%p1728_p10)
}
  0x22   : > { %s2206_s22 = smov 128   ;;  %s2207_s23 = smov 8  }
  0x23   : > { %s2218_s1 = sld [smem:[#allocation17_spill]]  ;;  %s1743_s14 = scalar_lea.vmem %s253_s18, 6144 }
  0x24   : > { %p1744_p13 = scmp.ne.s32.totalorder %s253_s18, %s1743_s14  ;;  %p1751_p3 = scmp.lt.s32.totalorder %s253_s18, %s253_s18 }
  0x25   : > { %p1752_p10 = scmp.lt.s32.totalorder %s1743_s14, %s1743_s14 }
  0x26   : > { %p1746_p0 = pnand %p1744_p13, %p1708_p12 }
  0x27   : > { %p1753_p7 = por %p1752_p10, %p1751_p3 }
  0x28   : > { %p1747_p5 = pneg %p1746_p0 }
  0x29   : > { %1627 = dma.hbm_to_vmem [thread:$0]  (!%p2015_p11), %s2218_s1, 6144, %s237_s15, [#allocation8], %s2206_s22, %s2206_s22, %s2207_s23  }
  0x2a   : > { %p1754_p9 = pnand %p1753_p7, %p1747_p5 }
  0x2c   : > { %1757 = shalt.err (!%p1754_p9)
}
  0x2d   : > { %s2219_s3 = sld [smem:[#allocation18_spill]]  ;;  %s1769_s15 = scalar_lea.vmem %s269_s20, 2048 }
  0x2e   : > { %p1770_p6 = scmp.ne.s32.totalorder %s269_s20, %s1769_s15  ;;  %p1777_p3 = scmp.lt.s32.totalorder %s269_s20, %s269_s20 }
  0x2f   : > { %p1778_p5 = scmp.lt.s32.totalorder %s1769_s15, %s1769_s15 }
  0x30   : > { %p1772_p13 = pnand %p1770_p6, %p1708_p12 }
  0x31   : > { %p1779_p10 = por %p1778_p5, %p1777_p3 }
  0x32   : > { %p1773_p0 = pneg %p1772_p13 }
  0x33   : > { %1630 = dma.hbm_to_vmem [thread:$0]  (!%p2015_p11), %s2219_s3, 6144, %s253_s18, [#allocation8], %s2206_s22, %s2206_s22, %s2207_s23  }
  0x34   : > { %p1780_p7 = pnand %p1779_p10, %p1773_p0 }
  0x36   : > { %1783 = shalt.err (!%p1780_p7)
}
  0x37   : > { %s2220_s5 = sld [smem:[#allocation19_spill]]  ;;  %s46_s18 = sadd.s32 1, %s1888_s26 }
  0x38   : > { %s37_s16 = sadd.s32 1, %s1896_s28  ;;  %p53_p6 = scmp.ne.s32.totalorder %s1888_s26, %s1884_s25 }
  0x39   : > { %p39_p12 = scmp.ge.s32.totalorder %s37_s16, 2  ;;  %p54_p9 = scmp.eq.s32.totalorder %s1900_s29, 0 }
  0x3a   : > { %p2061_p13 = por %p1990_p2, %p53_p6  ;;  %p1645_p0 = scmp.lt.s32.totalorder %s1900_s29, 2 }
  0x3b   : > { %s2234_s16 = smov (%p39_p12, %s37_s16), 0  ;;  %p55_p3 = por %p54_p9, %p53_p6 }
  0x3c   : > { %s2221_s8 = scalar_select %p2061_p13, 1, 0 }
  0x3d   : > { %1633 = dma.hbm_to_vmem [thread:$0]  (!%p2015_p11), %s2220_s5, 2048, %s269_s20, [#allocation11], %s2206_s22, %s2206_s22, %s2207_s23  }
  0x3e   : > { %s285_s14 = sand.u32 1, %s1888_s26   ;;  %s41_s17 = ssub.s32 %s1896_s28, %s2234_s16 }
  0x3f   : > { %p44_p5 = scmp.eq.s32.totalorder %s41_s17, 0  ;;  %s1218_s20 = sshll.u32 %s285_s14, 4 }
  0x40   : > { %s1235_s19 = sshll.u32 %s1896_s28, 8  ;;  %s289_s22 = scalar_lea.vmem [#allocation4], %s1218_s20 }
  0x41   : > { %s2073_s15 = scalar_select %p44_p5, %s1888_s26, %s46_s18  }
  0x42   : > { %s297_s10 = scalar_lea.hbm %s2198_s0, %s1235_s19  ;;  %s298_s23 = sshll.u32 %s289_s22, 4  ;;  %s299_s23 = int_to_ptr.vmem [resolvable:$true] %s298_s23 }
  0x43   : > { %p2080_p2 = pnand %p1645_p0, %p55_p3  ;;  %s286_s3 = scalar_lea.sflag [#allocation5], %s285_s14 }
  0x44   : > { %s1797_s17 = scalar_lea.vmem %s299_s23, 256  ;;  %s1907_s18 = smov [#allocation4]  }
  0x45   : > { %p1786_p11 = pneg %p2080_p2  ;;  %p1798_p10 = scmp.ne.s32.totalorder %s299_s23, %s1797_s17 }
  0x46   : > { %s1802_s5 = sshll.u32 %s1907_s18, 4  ;;  %s1803_s5 = int_to_ptr.vmem [resolvable:$false] %s1802_s5 }
  0x47   : > { %p1800_p7 = pnand %p1798_p10, %p1786_p11  ;;  %s1804_s19 = scalar_lea.vmem %s1803_s5, 512 }
  0x48   : > { %p1805_p12 = scmp.lt.s32.totalorder %s299_s23, %s1803_s5  ;;  %p1806_p9 = scmp.lt.s32.totalorder %s1804_s19, %s1797_s17 }
  0x49   : > { %p1801_p6 = pneg %p1800_p7 }
  0x4a   : > { %p1807_p5 = por %p1806_p9, %p1805_p12 }
  0x4c   : > { %p1808_p13 = pnand %p1807_p5, %p1801_p6 }
  0x4e   : > { %1811 = shalt.err (!%p1808_p13)
}
  0x4f   : > { %s2223_s22 = smov 8   ;;  %s2224_s20 = smov 128  }
  0x50   : > { %1637 = dma.hbm_to_vmem [thread:$0]  (!%p2080_p2), %s297_s10, 256, %s299_s23, %s286_s3, %s2224_s20, %s2224_s20, %s2223_s22  }
  0x51   : > { %310 = sbr.rel (%p2006_p8) target bundleno = 615 (0x267), region = 48  ;;  %s2094_s14 = sand.u32 (!%p2006_p8), 1, %s1884_s25  }
  0x52   : > { %s1222_s5 = sshll.u32 (!%p2006_p8), %s2094_s14, 4  ;;  %s313_s21 = scalar_lea.sflag (!%p2006_p8), [#allocation5], %s2094_s14 }
  0x53   : > { %s2100_s30 = scalar_lea.vmem (!%p2006_p8), [#allocation4], %s1222_s5 }
  0x56   : > { %1863 = dma.done.wait (%p1996_p4), %s313_s21, 256  }
  0x57   : > { %1865 = vsyncadd (%p1996_p4), %s313_s21, 4294967040 }
  0x58   : > { %1867 = dma.done.wait (%p1986_p1), [#allocation8], 12288  }
  0x59   : > { %1869 = vsyncadd (%p1986_p1), [#allocation8], 4294955008 }
  0x5a   : > { %1871 = dma.done.wait (%p1986_p1), [#allocation11], 2048  }
  0x5b   : > { %1873 = vsyncadd (%p1986_p1), [#allocation11], 4294965248  ;;  %v1908_v0 = vmov 0.0   ;;  %v403_v1 = vld [vmem:[#allocation7 + $0x78] sm:$0xff]  ;;  %v402_v2 = vld [vmem:[#allocation7 + $0x70] sm:$0xff]  ;;  %s358_s10 = scalar_lea.vmem [#allocation12], %s1222_s5 }
  0x5c   : > { %365 = vst [vmem:[#allocation2] sm:$0xff] %v1908_v0  ;;  %366 = vst [vmem:[#allocation3] sm:$0xff] %v1908_v0  ;;  %v499_v3 = vld [vmem:[#allocation7 + $0xf8] sm:$0xff]  ;;  %1363 = vmatprep.subr.mxu0 %v403_v1  ;;  %v498_v4 = vld [vmem:[#allocation7 + $0xf0] sm:$0xff]  ;;  %s1095_s17 = sshll.u32 %s358_s10, 4  ;;  %s1236_s18 = sshll.u32 %s1892_s27, 8  ;;  %s2145_s17 = int_to_ptr.vmem [resolvable:$true] %s1095_s17 }
  0x5d   : > { %1398 = vmatprep.subr.mxu1 %v499_v3  ;;  %1364 = vmatpush3.msra.mxu0 %v403_v1  ;;  %v401_v5 = vld [vmem:[#allocation7 + $0x68] sm:$0xff]  ;;  %v400_v7 = vld [vmem:[#allocation7 + $0x60] sm:$0xff]  ;;  %v399_v9 = vld [vmem:[#allocation7 + $0x58] sm:$0xff]  ;;  %s2150_s20 = scalar_lea.hbm %s2205_s7, %s1236_s18  ;;  %s1080_s5 = scalar_lea.sflag [#allocation6], %s2094_s14 }
  0x5e   : > { %1399 = vmatpush3.msra.mxu1 %v499_v3  ;;  %v497_v6 = vld [vmem:[#allocation7 + $0xe8] sm:$0xff]  ;;  %1365 = vmatprep.subr.mxu0 %v402_v2  ;;  %v496_v8 = vld [vmem:[#allocation7 + $0xe0] sm:$0xff]  ;;  %v495_v10 = vld [vmem:[#allocation7 + $0xd8] sm:$0xff]  ;;  %s1812_s21 = scalar_lea.vmem %s2145_s17, 256  ;;  %p2225_p4 = scmp.ne.s32.totalorder %s2221_s8, 0 }
  0x5f   : > { %1400 = vmatprep.subr.mxu1 %v498_v4  ;;  %1366 = vmatpush3.msra.mxu0 %v402_v2  ;;  %v398_v11 = vld [vmem:[#allocation7 + $0x50] sm:$0xff]  ;;  %v397_v13 = vld [vmem:[#allocation7 + $0x48] sm:$0xff]  ;;  %v396_v17 = vld [vmem:[#allocation7 + $0x40] sm:$0xff]  ;;  %p1813_p1 = scmp.ne.s32.totalorder %s2145_s17, %s1812_s21  ;;  %s1909_s27 = smov [#allocation12]  }
  0x60   : > { %1401 = vmatpush3.msra.mxu1 %v498_v4  ;;  %1367 = vmatprep.subr.mxu0 %v401_v5  ;;  %v494_v12 = vld [vmem:[#allocation7 + $0xd0] sm:$0xff]  ;;  %v493_v14 = vld [vmem:[#allocation7 + $0xc8] sm:$0xff]  ;;  %v492_v18 = vld [vmem:[#allocation7 + $0xc0] sm:$0xff] }
  0x61   : > { %1402 = vmatprep.subr.mxu1 %v497_v6  ;;  %1368 = vmatpush3.msra.mxu0 %v401_v5  ;;  %v2115_v15 = vld [vmem:[%s2100_s30] sm:$0xff]  ;;  %v2118_v16 = vld [vmem:[%s2100_s30 + $0x8] sm:$0xff]  ;;  %p1814_p8 = pnand %p1813_p1, %p2225_p4  ;;  %s1816_s30 = sshll.u32 %s1909_s27, 4  ;;  %s1817_s30 = int_to_ptr.vmem [resolvable:$false] %s1816_s30 }
  0x62   : > { %1403 = vmatpush3.msra.mxu1 %v497_v6  ;;  %1369 = vmatprep.subr.mxu0 %v400_v7  ;;  %377 = vst [vmem:[#allocation2 + $0x8] sm:$0xff] %v2115_v15  ;;  %378 = vst [vmem:[#allocation2 + $0x10] sm:$0xff] %v2118_v16  ;;  %v395_v19 = vld [vmem:[#allocation7 + $0x38] sm:$0xff]  ;;  %v394_v21 = vld [vmem:[#allocation7 + $0x30] sm:$0xff]  ;;  %s1818_s1 = scalar_lea.vmem %s1817_s30, 512  ;;  %p1819_p0 = scmp.lt.s32.totalorder %s2145_s17, %s1817_s30 }
  0x63   : > { %1404 = vmatprep.subr.mxu1 %v496_v8  ;;  %1370 = vmatpush3.msra.mxu0 %v400_v7  ;;  %v491_v20 = vld [vmem:[#allocation7 + $0xb8] sm:$0xff]  ;;  %v490_v22 = vld [vmem:[#allocation7 + $0xb0] sm:$0xff]  ;;  %v393_v23 = vld [vmem:[#allocation7 + $0x28] sm:$0xff]  ;;  %p1815_p13 = pneg %p1814_p8  ;;  %p1820_p3 = scmp.lt.s32.totalorder %s1818_s1, %s1812_s21 }
  0x64   : > { %1405 = vmatpush3.msra.mxu1 %v496_v8  ;;  %1371 = vmatprep.subr.mxu0 %v399_v9  ;;  %v489_v24 = vld [vmem:[#allocation7 + $0xa8] sm:$0xff]  ;;  %v392_v25 = vld [vmem:[#allocation7 + $0x20] sm:$0xff]  ;;  %v391_v27 = vld [vmem:[#allocation7 + $0x18] sm:$0xff] }
  0x65   : > { %1406 = vmatprep.subr.mxu1 %v495_v10  ;;  %1372 = vmatpush3.msra.mxu0 %v399_v9  ;;  %v488_v26 = vld [vmem:[#allocation7 + $0xa0] sm:$0xff]  ;;  %v487_v28 = vld [vmem:[#allocation7 + $0x98] sm:$0xff]  ;;  %v390_v29 = vld [vmem:[#allocation7 + $0x10] sm:$0xff]  ;;  %p1821_p2 = por %p1820_p3, %p1819_p0 }
  0x66   : > { %1407 = vmatpush3.msra.mxu1 %v495_v10  ;;  %1373 = vmatprep.subr.mxu0 %v398_v11  ;;  %v486_v30 = vld [vmem:[#allocation7 + $0x90] sm:$0xff]  ;;  %v389_v31 = vld [vmem:[#allocation7 + $0x8] sm:$0xff]  ;;  %v388_v34 = vld [vmem:[#allocation7] sm:$0xff] }
  0x67   : > { %1408 = vmatprep.subr.mxu1 %v494_v12  ;;  %1374 = vmatpush3.msra.mxu0 %v398_v11  ;;  %v485_v32 = vld [vmem:[#allocation7 + $0x88] sm:$0xff]  ;;  %v484_v35 = vld [vmem:[#allocation7 + $0x80] sm:$0xff]  ;;  %v595_v37 = vld [vmem:[#allocation7 + $0x178] sm:$0xff]  ;;  %p1822_p11 = pnand %p1821_p2, %p1815_p13 }
  0x68   : > { %1409 = vmatpush3.msra.mxu1 %v494_v12  ;;  %1375 = vmatprep.subr.mxu0 %v397_v13  ;;  %v594_v40 = vld [vmem:[#allocation7 + $0x170] sm:$0xff]  ;;  %v593_v41 = vld [vmem:[#allocation7 + $0x168] sm:$0xff]  ;;  %v592_v42 = vld [vmem:[#allocation7 + $0x160] sm:$0xff] }
  0x69   : > { %1410 = vmatprep.subr.mxu1 %v493_v14  ;;  %1376 = vmatpush3.msra.mxu0 %v397_v13  ;;  %v386_v33 = vld [vmem:[#allocation2 + $0x4] sm:$0xff]  ;;  %v387_v36 = vld [vmem:[#allocation2 + $0xc] sm:$0xff]  ;;  %v589_v45 = vld [vmem:[#allocation7 + $0x148] sm:$0xff] }
  0x6a   : > { %1411 = vmatpush3.msra.mxu1 %v493_v14  ;;  %1377 = vmatprep.subr.mxu0 %v396_v17  ;;  %v481_v38 = vld [vmem:[#allocation2 + $0x6] sm:$0xff]  ;;  %v482_v39 = vld [vmem:[#allocation2 + $0xe] sm:$0xff]  ;;  %v585_v49 = vld [vmem:[#allocation7 + $0x128] sm:$0xff] }
  0x6b   : > { %1412 = vmatprep.subr.mxu1 %v492_v18  ;;  %1378 = vmatpush3.msra.mxu0 %v396_v17  ;;  %v591_v43 = vld [vmem:[#allocation7 + $0x158] sm:$0xff]  ;;  %v590_v44 = vld [vmem:[#allocation7 + $0x150] sm:$0xff]  ;;  %v588_v46 = vld [vmem:[#allocation7 + $0x140] sm:$0xff] }
  0x6c   : > { %1413 = vmatpush3.msra.mxu1 %v492_v18  ;;  %1379 = vmatprep.subr.mxu0 %v395_v19  ;;  %v587_v47 = vld [vmem:[#allocation7 + $0x138] sm:$0xff]  ;;  %v586_v48 = vld [vmem:[#allocation7 + $0x130] sm:$0xff]  ;;  %v584_v50 = vld [vmem:[#allocation7 + $0x120] sm:$0xff] }
  0x6d   : > { %1414 = vmatprep.subr.mxu1 %v491_v20  ;;  %1380 = vmatpush3.msra.mxu0 %v395_v19  ;;  %v583_v51 = vld [vmem:[#allocation7 + $0x118] sm:$0xff]  ;;  %v582_v52 = vld [vmem:[#allocation7 + $0x110] sm:$0xff]  ;;  %v581_v53 = vld [vmem:[#allocation7 + $0x108] sm:$0xff] }
  0x6e   : > { %1415 = vmatpush3.msra.mxu1 %v491_v20  ;;  %1381 = vmatprep.subr.mxu0 %v394_v21  ;;  %v580_v54 = vld [vmem:[#allocation7 + $0x100] sm:$0xff]  ;;  %v701_v55 = vld [vmem:[#allocation9 + $0x78] sm:$0xff]  ;;  %v700_v57 = vld [vmem:[#allocation9 + $0x70] sm:$0xff] }
  0x6f   : > { %1416 = vmatprep.subr.mxu1 %v490_v22  ;;  %1382 = vmatpush3.msra.mxu0 %v394_v21  ;;  %v797_v56 = vld [vmem:[#allocation9 + $0xf8] sm:$0xff]  ;;  %v796_v58 = vld [vmem:[#allocation9 + $0xf0] sm:$0xff]  ;;  %v699_v59 = vld [vmem:[#allocation9 + $0x68] sm:$0xff] }
  0x70   : > { %1417 = vmatpush3.msra.mxu1 %v490_v22  ;;  %1383 = vmatprep.subr.mxu0 %v393_v23  ;;  %v795_v60 = vld [vmem:[#allocation9 + $0xe8] sm:$0xff]  ;;  %v698_v61 = vld [vmem:[#allocation9 + $0x60] sm:$0xff]  ;;  %v697_v63 = vld [vmem:[#allocation9 + $0x58] sm:$0xff] }
  0x71   : > { %1418 = vmatprep.subr.mxu1 %v489_v24  ;;  %1384 = vmatpush3.msra.mxu0 %v393_v23  ;;  %v794_v62 = vld [vmem:[#allocation9 + $0xe0] sm:$0xff]  ;;  %v793_v0 = vld [vmem:[#allocation9 + $0xd8] sm:$0xff]  ;;  %v696_v1 = vld [vmem:[#allocation9 + $0x50] sm:$0xff] }
  0x72   : > { %1419 = vmatpush3.msra.mxu1 %v489_v24  ;;  %1385 = vmatprep.subr.mxu0 %v392_v25  ;;  %v792_v2 = vld [vmem:[#allocation9 + $0xd0] sm:$0xff]  ;;  %v695_v3 = vld [vmem:[#allocation9 + $0x48] sm:$0xff]  ;;  %v694_v5 = vld [vmem:[#allocation9 + $0x40] sm:$0xff] }
  0x73   : > { %1420 = vmatprep.subr.mxu1 %v488_v26  ;;  %1386 = vmatpush3.msra.mxu0 %v392_v25  ;;  %v791_v4 = vld [vmem:[#allocation9 + $0xc8] sm:$0xff]  ;;  %v790_v6 = vld [vmem:[#allocation9 + $0xc0] sm:$0xff]  ;;  %v693_v7 = vld [vmem:[#allocation9 + $0x38] sm:$0xff] }
  0x74   : > { %1421 = vmatpush3.msra.mxu1 %v488_v26  ;;  %1387 = vmatprep.subr.mxu0 %v391_v27  ;;  %v789_v8 = vld [vmem:[#allocation9 + $0xb8] sm:$0xff]  ;;  %v692_v9 = vld [vmem:[#allocation9 + $0x30] sm:$0xff]  ;;  %v691_v11 = vld [vmem:[#allocation9 + $0x28] sm:$0xff] }
  0x75   : > { %1422 = vmatprep.subr.mxu1 %v487_v28  ;;  %1388 = vmatpush3.msra.mxu0 %v391_v27  ;;  %v788_v10 = vld [vmem:[#allocation9 + $0xb0] sm:$0xff]  ;;  %v787_v12 = vld [vmem:[#allocation9 + $0xa8] sm:$0xff]  ;;  %v690_v13 = vld [vmem:[#allocation9 + $0x20] sm:$0xff] }
  0x76   : > { %1423 = vmatpush3.msra.mxu1 %v487_v28  ;;  %1389 = vmatprep.subr.mxu0 %v390_v29  ;;  %v786_v14 = vld [vmem:[#allocation9 + $0xa0] sm:$0xff]  ;;  %v689_v17 = vld [vmem:[#allocation9 + $0x18] sm:$0xff]  ;;  %v688_v19 = vld [vmem:[#allocation9 + $0x10] sm:$0xff] }
  0x77   : > { %1424 = vmatprep.subr.mxu1 %v486_v30  ;;  %1390 = vmatpush3.msra.mxu0 %v390_v29  ;;  %v785_v18 = vld [vmem:[#allocation9 + $0x98] sm:$0xff]  ;;  %v784_v20 = vld [vmem:[#allocation9 + $0x90] sm:$0xff]  ;;  %v687_v21 = vld [vmem:[#allocation9 + $0x8] sm:$0xff] }
  0x78   : > { %1425 = vmatpush3.msra.mxu1 %v486_v30  ;;  %1391 = vmatprep.subr.mxu0 %v389_v31  ;;  %v783_v22 = vld [vmem:[#allocation9 + $0x88] sm:$0xff]  ;;  %v686_v23 = vld [vmem:[#allocation9] sm:$0xff]  ;;  %v893_v25 = vld [vmem:[#allocation9 + $0x178] sm:$0xff] }
  0x79   : > { %1426 = vmatprep.subr.mxu1 %v485_v32  ;;  %1392 = vmatpush3.msra.mxu0 %v389_v31  ;;  %v782_v24 = vld [vmem:[#allocation9 + $0x80] sm:$0xff]  ;;  %v990_v26 = vld [vmem:[#allocation10 + $0x78] sm:$0xff]  ;;  %v1227_v28 = vld [vmem:[%s2200_s2] ss:$0 sm:$0xff] }
  0x7a   : > { %1395 = vmatprep.mubr.f32.mxu0 %v386_v33  ;;  %1393 = vmatprep.subr.mxu0 %v388_v34 }
  0x7b   : > { %1427 = vmatpush3.msra.mxu1 %v485_v32  ;;  %1394 = vmatpush3.msra.mxu0 %v388_v34 }
  0x7c   : > { %1428 = vmatprep.subr.mxu1 %v484_v35  ;;  %1396 = vmatmul.mubr.f32.vlgmr.msra.gmra.mxu0 %v387_v36 }
  0x7d   : > { %1433 = vmatprep.subr.mxu0 %v595_v37  ;;  %1429 = vmatpush3.msra.mxu1 %v484_v35 }
  0x7e   : > { %1430 = vmatprep.mubr.f32.mxu1 %v481_v38  ;;  %1434 = vmatpush3.msra.mxu0 %v595_v37 }
  0x7f   : > { %1431 = vmatmul.mubr.f32.vlgmr.msra.gmra.mxu1 %v482_v39  ;;  %1435 = vmatprep.subr.mxu0 %v594_v40 }
  0x80   : > { %1465 = vmatprep.mubr.f32.mxu0 %v2115_v15  ;;  %1436 = vmatpush3.msra.mxu0 %v594_v40 }
  0x81   : > { %1437 = vmatprep.subr.mxu0 %v593_v41  ;;  %1468 = vmatprep.subr.mxu1 %v701_v55 }
  0x82   : > { %1438 = vmatpush3.msra.mxu0 %v593_v41  ;;  %1469 = vmatpush3.msra.mxu1 %v701_v55  ;;  %v985_v55 = vld [vmem:[#allocation10 + $0x50] sm:$0xff] }
  0x83   : > { %1439 = vmatprep.subr.mxu0 %v592_v42  ;;  %1470 = vmatprep.subr.mxu1 %v700_v57 }
  0x84   : > { %1440 = vmatpush3.msra.mxu0 %v592_v42  ;;  %1471 = vmatpush3.msra.mxu1 %v700_v57  ;;  %v984_v57 = vld [vmem:[#allocation10 + $0x48] sm:$0xff] }
  0x85   : > { %1441 = vmatprep.subr.mxu0 %v591_v43  ;;  %1472 = vmatprep.subr.mxu1 %v699_v59 }
  0x86   : > { %1442 = vmatpush3.msra.mxu0 %v591_v43  ;;  %1473 = vmatpush3.msra.mxu1 %v699_v59  ;;  %v983_v59 = vld [vmem:[#allocation10 + $0x40] sm:$0xff] }
  0x87   : > { %1443 = vmatprep.subr.mxu0 %v590_v44  ;;  %1474 = vmatprep.subr.mxu1 %v698_v61 }
  0x88   : > { %1444 = vmatpush3.msra.mxu0 %v590_v44  ;;  %1475 = vmatpush3.msra.mxu1 %v698_v61  ;;  %v982_v61 = vld [vmem:[#allocation10 + $0x38] sm:$0xff] }
  0x89   : > { %1445 = vmatprep.subr.mxu0 %v589_v45  ;;  %1476 = vmatprep.subr.mxu1 %v697_v63 }
  0x8a   : > { %1446 = vmatpush3.msra.mxu0 %v589_v45  ;;  %1477 = vmatpush3.msra.mxu1 %v697_v63  ;;  %v981_v63 = vld [vmem:[#allocation10 + $0x30] sm:$0xff] }
  0x8b   : > { %1447 = vmatprep.subr.mxu0 %v588_v46  ;;  %1478 = vmatprep.subr.mxu1 %v696_v1 }
  0x8c   : > { %1448 = vmatpush3.msra.mxu0 %v588_v46  ;;  %1479 = vmatpush3.msra.mxu1 %v696_v1  ;;  %v892_v46 = vld [vmem:[#allocation9 + $0x170] sm:$0xff]  ;;  %v980_v1 = vld [vmem:[#allocation10 + $0x28] sm:$0xff] }
  0x8d   : > { %1449 = vmatprep.subr.mxu0 %v587_v47  ;;  %1480 = vmatprep.subr.mxu1 %v695_v3 }
  0x8e   : > { %1450 = vmatpush3.msra.mxu0 %v587_v47  ;;  %1481 = vmatpush3.msra.mxu1 %v695_v3  ;;  %v989_v47 = vld [vmem:[#allocation10 + $0x70] sm:$0xff]  ;;  %v979_v3 = vld [vmem:[#allocation10 + $0x20] sm:$0xff] }
  0x8f   : > { %1451 = vmatprep.subr.mxu0 %v586_v48  ;;  %1482 = vmatprep.subr.mxu1 %v694_v5 }
  0x90   : > { %1452 = vmatpush3.msra.mxu0 %v586_v48  ;;  %1483 = vmatpush3.msra.mxu1 %v694_v5  ;;  %v891_v48 = vld [vmem:[#allocation9 + $0x168] sm:$0xff]  ;;  %v978_v5 = vld [vmem:[#allocation10 + $0x18] sm:$0xff] }
  0x91   : > { %1453 = vmatprep.subr.mxu0 %v585_v49  ;;  %1484 = vmatprep.subr.mxu1 %v693_v7 }
  0x92   : > { %1454 = vmatpush3.msra.mxu0 %v585_v49  ;;  %1485 = vmatpush3.msra.mxu1 %v693_v7  ;;  %v988_v49 = vld [vmem:[#allocation10 + $0x68] sm:$0xff]  ;;  %v977_v7 = vld [vmem:[#allocation10 + $0x10] sm:$0xff] }
  0x93   : > { %1455 = vmatprep.subr.mxu0 %v584_v50  ;;  %1486 = vmatprep.subr.mxu1 %v692_v9 }
  0x94   : > { %1456 = vmatpush3.msra.mxu0 %v584_v50  ;;  %1487 = vmatpush3.msra.mxu1 %v692_v9  ;;  %v890_v50 = vld [vmem:[#allocation9 + $0x160] sm:$0xff]  ;;  %v976_v9 = vld [vmem:[#allocation10 + $0x8] sm:$0xff] }
  0x95   : > { %1457 = vmatprep.subr.mxu0 %v583_v51  ;;  %1488 = vmatprep.subr.mxu1 %v691_v11 }
  0x96   : > { %1458 = vmatpush3.msra.mxu0 %v583_v51  ;;  %1489 = vmatpush3.msra.mxu1 %v691_v11  ;;  %v987_v51 = vld [vmem:[#allocation10 + $0x60] sm:$0xff] }
  0x97   : > { %1459 = vmatprep.subr.mxu0 %v582_v52  ;;  %1490 = vmatprep.subr.mxu1 %v690_v13  ;;  %v975_v11 = vld [vmem:[#allocation10] sm:$0xff] }
  0x98   : > { %1460 = vmatpush3.msra.mxu0 %v582_v52  ;;  %1491 = vmatpush3.msra.mxu1 %v690_v13  ;;  %v889_v52 = vld [vmem:[#allocation9 + $0x158] sm:$0xff]  ;;  %v1228_v13 = vld [vmem:[%s2202_s4] ss:$0 sm:$0xff] }
  0x99   : > { %1461 = vmatprep.subr.mxu0 %v581_v53  ;;  %1492 = vmatprep.subr.mxu1 %v689_v17 }
  0x9a   : > { %1462 = vmatpush3.msra.mxu0 %v581_v53  ;;  %1493 = vmatpush3.msra.mxu1 %v689_v17  ;;  %v986_v53 = vld [vmem:[#allocation10 + $0x58] sm:$0xff] }
  0x9b   : > { %1463 = vmatprep.subr.mxu0 %v580_v54  ;;  %1494 = vmatprep.subr.mxu1 %v688_v19 }
  0x9c   : > { %1464 = vmatpush3.msra.mxu0 %v580_v54  ;;  %1495 = vmatpush3.msra.mxu1 %v688_v19  ;;  %v888_v54 = vld [vmem:[#allocation9 + $0x150] sm:$0xff] }
  0x9d   : > { %1466 = vmatmul.mubr.f32.vlgmr.msra.gmra.mxu0 %v2118_v16  ;;  %1503 = vmatprep.subr.mxu0 %v797_v56 }
  0x9e   : > { %1504 = vmatpush3.msra.mxu0 %v797_v56  ;;  %1496 = vmatprep.subr.mxu1 %v687_v21  ;;  %v887_v56 = vld [vmem:[#allocation9 + $0x148] sm:$0xff] }
  0x9f   : > { %1505 = vmatprep.subr.mxu0 %v796_v58  ;;  %1497 = vmatpush3.msra.mxu1 %v687_v21 }
  0xa0   : > { %1506 = vmatpush3.msra.mxu0 %v796_v58  ;;  %1498 = vmatprep.subr.mxu1 %v686_v23  ;;  %v886_v58 = vld [vmem:[#allocation9 + $0x140] sm:$0xff] }
  0xa1   : > { %1507 = vmatprep.subr.mxu0 %v795_v60  ;;  %1499 = vmatpush3.msra.mxu1 %v686_v23 }
  0xa2   : > { %1508 = vmatpush3.msra.mxu0 %v795_v60  ;;  %1538 = vmatprep.subr.mxu1 %v893_v25  ;;  %v885_v60 = vld [vmem:[#allocation9 + $0x138] sm:$0xff] }
  0xa3   : > { %1509 = vmatprep.subr.mxu0 %v794_v62 }
  0xa4   : > { %1510 = vmatpush3.msra.mxu0 %v794_v62  ;;  %v884_v62 = vld [vmem:[#allocation9 + $0x130] sm:$0xff] }
  0xa5   : > { %1511 = vmatprep.subr.mxu0 %v793_v0 }
  0xa6   : > { %1512 = vmatpush3.msra.mxu0 %v793_v0  ;;  %v883_v0 = vld [vmem:[#allocation9 + $0x128] sm:$0xff] }
  0xa7   : > { %1513 = vmatprep.subr.mxu0 %v792_v2 }
  0xa8   : > { %1514 = vmatpush3.msra.mxu0 %v792_v2  ;;  %v882_v2 = vld [vmem:[#allocation9 + $0x120] sm:$0xff] }
  0xa9   : > { %1515 = vmatprep.subr.mxu0 %v791_v4 }
  0xaa   : > { %1516 = vmatpush3.msra.mxu0 %v791_v4  ;;  %v881_v4 = vld [vmem:[#allocation9 + $0x118] sm:$0xff] }
  0xab   : > { %1517 = vmatprep.subr.mxu0 %v790_v6 }
  0xac   : > { %1518 = vmatpush3.msra.mxu0 %v790_v6  ;;  %v880_v6 = vld [vmem:[#allocation9 + $0x110] sm:$0xff] }
  0xad   : > { %1519 = vmatprep.subr.mxu0 %v789_v8 }
  0xae   : > { %1520 = vmatpush3.msra.mxu0 %v789_v8  ;;  %v879_v8 = vld [vmem:[#allocation9 + $0x108] sm:$0xff] }
  0xaf   : > { %1521 = vmatprep.subr.mxu0 %v788_v10 }
  0xb0   : > { %1522 = vmatpush3.msra.mxu0 %v788_v10  ;;  %v878_v10 = vld [vmem:[#allocation9 + $0x100] sm:$0xff] }
  0xb1   : > { %1523 = vmatprep.subr.mxu0 %v787_v12 }
  0xb2   : > { %1524 = vmatpush3.msra.mxu0 %v787_v12 }
  0xb3   : > { %1525 = vmatprep.subr.mxu0 %v786_v14 }
  0xb4   : > { %1526 = vmatpush3.msra.mxu0 %v786_v14 }
  0xb5   : > { %1527 = vmatprep.subr.mxu0 %v785_v18 }
  0xb6   : > { %1528 = vmatpush3.msra.mxu0 %v785_v18 }
  0xb7   : > { %1529 = vmatprep.subr.mxu0 %v784_v20 }
  0xb8   : > { %1530 = vmatpush3.msra.mxu0 %v784_v20 }
  0xb9   : > { %1531 = vmatprep.subr.mxu0 %v783_v22 }
  0xba   : > { %1532 = vmatpush3.msra.mxu0 %v783_v22 }
  0xbb   : > { %1533 = vmatprep.subr.mxu0 %v782_v24 }
  0xbc   : > { %1534 = vmatpush3.msra.mxu0 %v782_v24 }
  0xbd   : > { %1573 = vmatprep.subr.mxu0 %v990_v26 }
 0x13c   : > { %v1397_v27 = vpop.f32.mrf.mxu0 }
 0x13d   : > { %v480_v31 = vadd.f32 %v1397_v27, %v1227_v28 }
 0x13e   : > { %v470_v29 = vpop.f32.mrf.mxu0 }
 0x13f   : > { %v1432_v30 = vpop.f32.mrf.mxu1  ;;  %v479_v32 = vadd.f32 %v1227_v28, %v470_v29 }
 0x140   : > { %v576_v34 = vadd.f32 %v1432_v30, %v480_v31 }
 0x141   : > { %v566_v33 = vpop.f32.mrf.mxu1 }
 0x142   : > { %v575_v36 = vadd.f32 %v566_v33, %v479_v32 }
 0x15d   : > { %v1467_v35 = vpop.f32.mrf.mxu0 }
 0x15e   : > { %v2127_v37 = vadd.f32 %v1467_v35, %v576_v34 }
 0x15f   : > { %v662_v38 = vpop.f32.mrf.mxu0 }
 0x160   : > { %v674_v39 = vmax.f32 %v2127_v37, 0.0  ;;  %v671_v40 = vadd.f32 %v662_v38, %v575_v36 }
 0x162   : > { %676 = vst [vmem:[#allocation3 + $0x10] sm:$0xff] %v674_v39  ;;  %v673_v41 = vmax.f32 %v671_v40, 0.0 }
 0x164   : > { %675 = vst [vmem:[#allocation3 + $0x8] sm:$0xff] %v673_v41 }
 0x16b   : > { %v684_v42 = vld [vmem:[#allocation3 + $0x4] sm:$0xff]  ;;  %v685_v44 = vld [vmem:[#allocation3 + $0xc] sm:$0xff] }
 0x16c   : > { %v779_v43 = vld [vmem:[#allocation3 + $0x6] sm:$0xff]  ;;  %1500 = vmatprep.mubr.f32.mxu1 %v684_v42  ;;  %v780_v45 = vld [vmem:[#allocation3 + $0xe] sm:$0xff] }
 0x16d   : > { %1535 = vmatprep.mubr.f32.mxu0 %v779_v43  ;;  %1501 = vmatmul.mubr.f32.vlgmr.msra.gmra.mxu1 %v685_v44 }
 0x16e   : > { %1536 = vmatmul.mubr.f32.vlgmr.msra.gmra.mxu0 %v780_v45  ;;  %1539 = vmatpush3.msra.mxu1 %v893_v25 }
 0x16f   : > { %1574 = vmatpush3.msra.mxu0 %v990_v26  ;;  %1540 = vmatprep.subr.mxu1 %v892_v46 }
 0x170   : > { %1570 = vmatprep.mubr.f32.mxu1 %v673_v41  ;;  %1575 = vmatprep.subr.mxu0 %v989_v47 }
 0x171   : > { %1541 = vmatpush3.msra.mxu1 %v892_v46  ;;  %1576 = vmatpush3.msra.mxu0 %v989_v47 }
 0x172   : > { %1542 = vmatprep.subr.mxu1 %v891_v48  ;;  %1577 = vmatprep.subr.mxu0 %v988_v49 }
 0x173   : > { %1543 = vmatpush3.msra.mxu1 %v891_v48  ;;  %1578 = vmatpush3.msra.mxu0 %v988_v49 }
 0x174   : > { %1544 = vmatprep.subr.mxu1 %v890_v50  ;;  %1579 = vmatprep.subr.mxu0 %v987_v51 }
 0x175   : > { %1545 = vmatpush3.msra.mxu1 %v890_v50  ;;  %1580 = vmatpush3.msra.mxu0 %v987_v51 }
 0x176   : > { %1546 = vmatprep.subr.mxu1 %v889_v52  ;;  %1581 = vmatprep.subr.mxu0 %v986_v53 }
 0x177   : > { %1547 = vmatpush3.msra.mxu1 %v889_v52  ;;  %1582 = vmatpush3.msra.mxu0 %v986_v53 }
 0x178   : > { %1548 = vmatprep.subr.mxu1 %v888_v54  ;;  %1583 = vmatprep.subr.mxu0 %v985_v55 }
 0x179   : > { %1549 = vmatpush3.msra.mxu1 %v888_v54  ;;  %1584 = vmatpush3.msra.mxu0 %v985_v55 }
 0x17a   : > { %1550 = vmatprep.subr.mxu1 %v887_v56  ;;  %1585 = vmatprep.subr.mxu0 %v984_v57 }
 0x17b   : > { %1551 = vmatpush3.msra.mxu1 %v887_v56  ;;  %1586 = vmatpush3.msra.mxu0 %v984_v57 }
 0x17c   : > { %1552 = vmatprep.subr.mxu1 %v886_v58  ;;  %1587 = vmatprep.subr.mxu0 %v983_v59 }
 0x17d   : > { %1553 = vmatpush3.msra.mxu1 %v886_v58  ;;  %1588 = vmatpush3.msra.mxu0 %v983_v59 }
 0x17e   : > { %1554 = vmatprep.subr.mxu1 %v885_v60  ;;  %1589 = vmatprep.subr.mxu0 %v982_v61 }
 0x17f   : > { %1555 = vmatpush3.msra.mxu1 %v885_v60  ;;  %1590 = vmatpush3.msra.mxu0 %v982_v61 }
 0x180   : > { %1556 = vmatprep.subr.mxu1 %v884_v62  ;;  %1591 = vmatprep.subr.mxu0 %v981_v63 }
 0x181   : > { %1557 = vmatpush3.msra.mxu1 %v884_v62  ;;  %1592 = vmatpush3.msra.mxu0 %v981_v63 }
 0x182   : > { %1558 = vmatprep.subr.mxu1 %v883_v0  ;;  %1593 = vmatprep.subr.mxu0 %v980_v1 }
 0x183   : > { %1559 = vmatpush3.msra.mxu1 %v883_v0  ;;  %1594 = vmatpush3.msra.mxu0 %v980_v1 }
 0x184   : > { %1560 = vmatprep.subr.mxu1 %v882_v2  ;;  %1595 = vmatprep.subr.mxu0 %v979_v3 }
 0x185   : > { %1561 = vmatpush3.msra.mxu1 %v882_v2  ;;  %1596 = vmatpush3.msra.mxu0 %v979_v3 }
 0x186   : > { %1562 = vmatprep.subr.mxu1 %v881_v4  ;;  %1597 = vmatprep.subr.mxu0 %v978_v5 }
 0x187   : > { %1563 = vmatpush3.msra.mxu1 %v881_v4  ;;  %1598 = vmatpush3.msra.mxu0 %v978_v5 }
 0x188   : > { %1564 = vmatprep.subr.mxu1 %v880_v6  ;;  %1599 = vmatprep.subr.mxu0 %v977_v7 }
 0x189   : > { %1565 = vmatpush3.msra.mxu1 %v880_v6  ;;  %1600 = vmatpush3.msra.mxu0 %v977_v7 }
 0x18a   : > { %1566 = vmatprep.subr.mxu1 %v879_v8  ;;  %1601 = vmatprep.subr.mxu0 %v976_v9 }
 0x18b   : > { %1567 = vmatpush3.msra.mxu1 %v879_v8  ;;  %1602 = vmatpush3.msra.mxu0 %v976_v9 }
 0x18c   : > { %1568 = vmatprep.subr.mxu1 %v878_v10  ;;  %1603 = vmatprep.subr.mxu0 %v975_v11 }
 0x18d   : > { %1569 = vmatpush3.msra.mxu1 %v878_v10  ;;  %1604 = vmatpush3.msra.mxu0 %v975_v11 }
 0x18e   : > { %1605 = vmatprep.mubr.f32.mxu0 %v2115_v15  ;;  %1571 = vmatmul.mubr.f32.vlgmr.msra.gmra.mxu1 %v674_v39  ;;  %v1229_v15 = vld [vmem:[%s2204_s6] ss:$0 sm:$0xff] }
 0x18f   : > { %1606 = vmatmul.mubr.f32.vlgmr.msra.gmra.mxu0 %v2118_v16 }
 0x22d   : > { %v1502_v12 = vpop.f32.mrf.mxu1 }
 0x22e   : > { %v1537_v14 = vpop.f32.mrf.mxu0  ;;  %v778_v18 = vadd.f32 %v1502_v12, %v1228_v13 }
 0x22f   : > { %v768_v17 = vpop.f32.mrf.mxu1 }
 0x230   : > { %v777_v19 = vadd.f32 %v1228_v13, %v768_v17  ;;  %v864_v20 = vpop.f32.mrf.mxu0  ;;  %v874_v21 = vadd.f32 %v1537_v14, %v778_v18 }
 0x232   : > { %v873_v16 = vadd.f32 %v864_v20, %v777_v19 }
 0x24e   : > { %v1572_v22 = vpop.f32.mrf.mxu1 }
 0x24f   : > { %v1607_v23 = vpop.f32.mrf.mxu0  ;;  %v970_v24 = vadd.f32 %v1572_v22, %v874_v21 }
 0x250   : > { %v1070_v25 = vadd.f32 %v1607_v23, %v1229_v15  ;;  %v960_v26 = vpop.f32.mrf.mxu1 }
 0x251   : > { %v1064_v27 = vpop.f32.mrf.mxu0  ;;  %v972_v28 = vmax.f32 %v970_v24, 0.0  ;;  %v969_v29 = vadd.f32 %v960_v26, %v873_v16 }
 0x252   : > { %v1065_v32 = vadd.f32 %v1229_v15, %v1064_v27 }
 0x253   : > { %v1074_v30 = vadd.f32 %v1070_v25, %v972_v28  ;;  %v971_v31 = vmax.f32 %v969_v29, 0.0 }
 0x255   : > { %v1076_v33 = vmax.f32 %v1074_v30, 0.0  ;;  %v1073_v34 = vadd.f32 %v1065_v32, %v971_v31 }
 0x257   : > { %1078 = vst [vmem:[%s358_s10 + $0x8] sm:$0xff] %v1076_v33  ;;  %v1075_v35 = vmax.f32 %v1073_v34, 0.0 }
 0x259   : > { %1077 = vst [vmem:[%s358_s10] sm:$0xff] %v1075_v35 }
 0x25a   : > { %1825 = shalt.err (!%p1822_p11)
}
 0x25b   : > { %s1826_s3 = scalar_lea.hbm %s2150_s20, 256  ;;  %s1830_s13 = scalar_lea.hbm %s2205_s7, 512 }
 0x25c   : > { %p1827_p10 = scmp.ne.s32.totalorder %s2150_s20, %s1826_s3  ;;  %p1831_p12 = scmp.lt.s32.totalorder %s2150_s20, %s2205_s7 }
 0x25d   : > { %p1832_p9 = scmp.lt.s32.totalorder %s1830_s13, %s1826_s3 }
 0x25e   : > { %p1828_p7 = pnand %p1827_p10, %p2225_p4 }
 0x25f   : > { %p1833_p5 = por %p1832_p9, %p1831_p12 }
 0x260   : > { %p1829_p6 = pneg %p1828_p7 }
 0x262   : > { %p1834_p1 = pnand %p1833_p5, %p1829_p6 }
 0x264   : > { %1837 = shalt.err (!%p1834_p1)
}
 0x265   : > { %s1910_s18 = smov 128   ;;  %s1911_s19 = smov 8  }
 0x266   : > { %1622 = dma.vmem_to_hbm [thread:$0]  (%p2225_p4), %s2145_s17, 256, %s2150_s20, %s1080_s5, %s1910_s18, %s1910_s18, %s1911_s19  }
 0x267 PF: > { %s1110_s22 = sand.u32 1, %s1880_s24   ;;  %p2226_p8 = scmp.ne.s32.totalorder %s2215_s12, 0 }
 0x268   : > { %p2227_p13 = scmp.ge.s32.totalorder %s1900_s29, 2  ;;  %s1111_s21 = scalar_lea.sflag [#allocation6], %s1110_s22 }
 0x26a   : > { %p1639_p0 = pnand %p2227_p13, %p2226_p8 }
 0x26c   : > { %p1640_p3 = pneg %p1639_p0 }
 0x26e   : > { %1875 = dma.done.wait (%p1640_p3), %s1111_s21, 256  }
 0x26f   : > { %1877 = vsyncadd (%p1640_p3), %s1111_s21, 4294967040  ;;  %s25_s29 = sadd.s32 1, %s1900_s29   ;;  %s2228_s24 = smov %s1884_s25 }
 0x270   : > { %p22_p2 = scmp.ge.s32.totalorder %s25_s29, 4   ;;  %s2229_s25 = smov %s1888_s26 }
 0x271   : > { %s2230_s26 = smov %s2073_s15  ;;  %s2231_s27 = smov %s1896_s28 }
 0x272   : > { %s2232_s28 = smov %s2234_s16  ;;  %24 = sbr.rel (!%p22_p2) target bundleno = 12 (0xc), region = 117 }
 0x277   :  { %1116 = vsyncpa [#allocation5], 1 }
 0x278   :  { %1118 = vsyncpa [#allocation5 + $0x1], 1 }
 0x279   :  { %1119 = vsyncpa [#allocation8], 1 }
 0x27a   :  { %1120 = vsyncpa [#allocation11], 1 }
 0x27b   :  { %1121 = vsyncpa [#allocation6], 1 }
 0x27c   :  { %1123 = vsyncpa [#allocation6 + $0x1], 1 }

</bundles_post_ra>
